<compile_context>
chip_gen: v7x
topology: tpu7x:2x2x1
jax: 0.10.0
libtpu: 0.0.40
codegen_flags: <defaults>
</compile_context>

<pallas_src>
from math import sqrt

import numpy as np
import jax
import jax.numpy as jnp
from jax.experimental import pallas as pl
from jax.experimental.pallas import tpu as pltpu

_MiB = 1024 * 1024
# Conservative per-kernel VMEM budget, sized for v7x (64 MiB physical, the
# smallest of v5e/v6e/v7x) with headroom for Mosaic-internal scratch.
_VMEM_BUDGET = 44 * _MiB


def _vmem_limit(est_bytes):
    """Explicit scoped-VMEM limit: generous, but capped under v7x's 64 MiB."""
    return int(min(60 * _MiB, max(32 * _MiB, 2 * est_bytes)))


def _pick_row_tile(M, S, cap):
    """Largest row tile <= cap that divides M, is sublane friendly (multiple of
    8 or == M) and aligns with sequence boundaries (divides S or is a multiple
    of S).  Prefers a tile that leaves >= 2 grid blocks so v7x's second
    TensorCore has work."""
    cands = [d for d in range(1, min(cap, M) + 1)
             if M % d == 0
             and (d % 8 == 0 or d == M)
             and (d % S == 0 or S % d == 0)]
    if not cands:
        return M
    multi = [d for d in cands if M // d >= 2]
    return max(multi) if multi else max(cands)


def _pick_lane_tile(n, cap):
    """Largest d <= cap with n % d == 0 and (d % 128 == 0 or d == n)."""
    for d in range(min(cap, n), 0, -1):
        if n % d == 0 and (d % 128 == 0 or d == n):
            return d
    return n


# --------------------------------------------------------------------------
# Kernel 1: embedding gather (as one-hot MXU matmul) + positional add.
# --------------------------------------------------------------------------
def embed_indices(indices, token_table, pos_table):
    B, S = indices.shape
    V, H = token_table.shape
    assert pos_table.shape[0] >= S + 1, "max_len must be >= seq_len + 1"

    # Token table stays resident in VMEM, single-buffered.
    # TODO(synk): for tables above this cap, switch to an HBM-resident table
    # (memory_space=pl.ANY) with double-buffered make_async_copy row gathers.
    table_bytes = V * H * 4
    assert table_bytes <= 40 * _MiB, "token table too large for resident-VMEM path"

    M = B * S
    TS = _pick_row_tile(M, S, cap=256)   # tokens per grid step
    ps = min(TS, S)                      # positional rows streamed per step
    reps = TS // ps                      # whole sequences covered per step

    ids2 = indices.reshape(M, 1).astype(jnp.int32)
    pos_slab = pos_table[1:S + 1]        # (S, H): positions 1..S (static slice)

    def kernel(idx_ref, tok_ref, pos_ref, o_ref):
        # idx_ref: (TS, 1) int32 | tok_ref: (V, H) f32 resident | pos_ref: (ps, H)
        ids = idx_ref[...]                                            # (TS, 1)
        cols = jax.lax.broadcasted_iota(jnp.int32, (TS, V), 1)        # (TS, V)
        onehot = (cols == ids).astype(tok_ref.dtype)                  # exact 0/1
        # Gather-as-matmul on the otherwise idle MXU; ids >= V yield zero rows.
        emb = jnp.dot(onehot, tok_ref[...], preferred_element_type=jnp.float32)
        pos = pos_ref[...]
        if reps > 1:                       # one tile spans `reps` full sequences
            pos = jnp.concatenate([pos] * reps, axis=0)
        o_ref[...] = (emb + pos).astype(o_ref.dtype)

    est = (table_bytes                     # resident table (single buffer)
           + 2 * ps * H * 4                # positional tiles
           + 2 * TS * 4                    # id tiles
           + 2 * TS * H * 4                # output tiles
           + TS * V * 4 + TS * H * 4)      # in-kernel temporaries
    assert est <= _VMEM_BUDGET, "integer-path tiles exceed VMEM budget"

    def run(single_buffer_table):
        if single_buffer_table:
            # Constant block index -> fetched once; Buffered(1) drops the
            # pointless second copy of the table from VMEM.
            table_spec = pl.BlockSpec((V, H), lambda i: (0, 0),
                                      pipeline_mode=pl.Buffered(1))
        else:
            table_spec = pl.BlockSpec((V, H), lambda i: (0, 0))
        grid_spec = pltpu.PrefetchScalarGridSpec(
            num_scalar_prefetch=0,
            grid=(M // TS,),
            in_specs=[
                pl.BlockSpec((TS, 1), lambda i: (i, 0)),
                table_spec,
                pl.BlockSpec((ps, H), lambda i: (i % (S // ps), 0)),
            ],
            out_specs=pl.BlockSpec((TS, H), lambda i: (i, 0)),
        )
        return pl.pallas_call(
            kernel,
            out_shape=jax.ShapeDtypeStruct((M, H), token_table.dtype),
            grid_spec=grid_spec,
            compiler_params=pltpu.CompilerParams(
                dimension_semantics=("parallel",),
                vmem_limit_bytes=_vmem_limit(est)),
        )(ids2, token_table, pos_slab)

    try:
        out2 = run(single_buffer_table=True)
    except Exception:
        # Fallback for JAX builds without BlockSpec pipeline_mode support.
        out2 = run(single_buffer_table=False)
    return out2.reshape(B, S, H)


# --------------------------------------------------------------------------
# Kernel 2: soft ("mixed") path — (B*S, V) @ (V, H) MXU matmul + positional add.
# f32 activations cast to bf16 in-kernel, f32 accumulator, K innermost.
# --------------------------------------------------------------------------
def embed_mixed(x, token_table, pos_table):
    B, S, V = x.shape
    Vt, H = token_table.shape
    assert Vt == V
    assert pos_table.shape[0] >= S + 1, "max_len must be >= seq_len + 1"

    M = B * S
    x2 = x.reshape(M, V)                       # stays f32; cast in the kernel
    w = token_table.astype(jnp.bfloat16)       # pre-cast: re-streamed per M block
    pos_slab = pos_table[1:S + 1]              # (S, H) f32 — no jnp.tile

    tm = _pick_row_tile(M, S, cap=512)
    tn = _pick_lane_tile(H, cap=2048)
    tk = _pick_lane_tile(V, cap=2048)
    ps = min(tm, S)
    reps = tm // ps

    def est_bytes(tk_):
        return (2 * tm * tk_ * 4               # x f32 tiles (double-buffered)
                + 2 * tk_ * tn * 2             # w bf16 tiles
                + 2 * ps * tn * 4              # positional tiles
                + 2 * tm * tn * 4              # output tiles
                + tm * tn * 4)                 # f32 accumulator scratch

    # Shrink the K tile until the per-step working set fits the v7x-safe budget.
    while (est_bytes(tk) > _VMEM_BUDGET and tk % 256 == 0
           and V % (tk // 2) == 0 and tk // 2 >= 128):
        tk //= 2
    est = est_bytes(tk)
    assert est <= _VMEM_BUDGET, "mixed-path tiles exceed VMEM budget"

    def kernel(x_ref, w_ref, pos_ref, o_ref, acc_ref):
        k = pl.program_id(2)

        @pl.when(k == 0)
        def _init():
            acc_ref[...] = jnp.zeros_like(acc_ref)

        # Cast activations on the VPU (fused; no extra HBM pass over x).
        acc_ref[...] += jnp.dot(x_ref[...].astype(jnp.bfloat16), w_ref[...],
                                preferred_element_type=jnp.float32)

        @pl.when(k == pl.num_programs(2) - 1)
        def _finalize():
            pos = pos_ref[...]
            if reps > 1:                       # tile spans `reps` full sequences
                pos = jnp.concatenate([pos] * reps, axis=0)
            o_ref[...] = (acc_ref[...] + pos).astype(o_ref.dtype)

    grid_spec = pltpu.PrefetchScalarGridSpec(
        num_scalar_prefetch=0,
        grid=(M // tm, H // tn, V // tk),
        in_specs=[
            pl.BlockSpec((tm, tk), lambda i, n, k: (i, k)),         # x tile (f32)
            pl.BlockSpec((tk, tn), lambda i, n, k: (k, n)),         # w tile (bf16)
            pl.BlockSpec((ps, tn), lambda i, n, k: (i % (S // ps), n)),  # pos tile
        ],
        out_specs=pl.BlockSpec((tm, tn), lambda i, n, k: (i, n)),
        scratch_shapes=[pltpu.VMEM((tm, tn), jnp.float32)],
    )
    out2 = pl.pallas_call(
        kernel,
        out_shape=jax.ShapeDtypeStruct((M, H), jnp.float32),
        grid_spec=grid_spec,
        compiler_params=pltpu.CompilerParams(
            dimension_semantics=("parallel", "parallel", "arbitrary"),
            vmem_limit_bytes=_vmem_limit(est)),
        cost_estimate=pl.CostEstimate(
            flops=2 * M * V * H,
            transcendentals=0,
            bytes_accessed=M * V * 4 + V * H * 2 + S * H * 4 + M * H * 4),
    )(x2, w, pos_slab)
    return out2.reshape(B, S, H)


# --------------------------------------------------------------------------
# Module-equivalent wrapper with deterministic parameter init.
# --------------------------------------------------------------------------
class Embeddings:
    def __init__(self, vocab_size, max_len, h_size, key):
        self.vocab_size = vocab_size
        self.max_len = max_len
        self.h_size = h_size
        # TODO(synk): original loads pretrained word2vec KeyedVectors from `path`;
        # here we use the module's fallback init (randn / sqrt(h_size)) deterministically.
        self.token_weight = (
            jax.random.normal(key, (vocab_size, h_size), dtype=jnp.float32)
            / sqrt(h_size)
        )
        self.pos_weight = jnp.asarray(self._position_encoding(), dtype=jnp.float32)

    def _position_encoding(self):
        enc = np.array(
            [[pos / np.power(10000, 2 * i / self.h_size) for i in range(self.h_size)]
             if pos != 0 else np.zeros(self.h_size)
             for pos in range(self.max_len)]
        )
        enc[1:, 0::2] = np.sin(enc[1:, 0::2])
        enc[1:, 1::2] = np.cos(enc[1:, 1::2])
        return enc

    def __call__(self, x):
        if x.ndim == 3:
            return embed_mixed(x, self.token_weight, self.pos_weight)
        return embed_indices(x, self.token_weight, self.pos_weight)


if __name__ == "__main__":
    vocab_size, max_len, h_size = 64, 16, 128
    B, S = 2, 8

    key = jax.random.PRNGKey(0)
    k_w, k_idx, k_mix = jax.random.split(key, 3)

    emb = Embeddings(vocab_size, max_len, h_size, k_w)

    # --- integer-index path --------------------------------------------------
    idx = jax.random.randint(k_idx, (B, S), 0, vocab_size, dtype=jnp.int32)
    out_idx = jax.block_until_ready(emb(idx))
    ref_idx = jnp.take(emb.token_weight, idx, axis=0) + emb.pos_weight[1:S + 1][None]
    assert out_idx.shape == (B, S, h_size)
    assert jnp.allclose(out_idx, ref_idx, atol=5e-3, rtol=1e-3), \
        float(jnp.max(jnp.abs(out_idx - ref_idx)))

    # --- mixed (soft one-hot) path -------------------------------------------
    x_mixed = jax.random.uniform(k_mix, (B, S, vocab_size), dtype=jnp.float32)
    out_mix = jax.block_until_ready(emb(x_mixed))
    ref_mix = (jnp.einsum("bsv,vh->bsh", x_mixed, emb.token_weight)
               + emb.pos_weight[1:S + 1][None])
    assert out_mix.shape == (B, S, h_size)
    # bf16 matmul operands (f32 accumulation) -> loosened tolerance vs f32 ref.
    assert jnp.allclose(out_mix, ref_mix, atol=1e-2, rtol=1e-2), \
        float(jnp.max(jnp.abs(out_mix - ref_mix)))

    print("KERNEL_OK")
</pallas_src>

<mosaic_0001>
module attributes {stable_mosaic.version = 11 : i64} {
  func.func @kernel(%arg0: i32, %arg1: memref<8x1xi32, #tpu.memory_space<vmem>>, %arg2: memref<64x128xf32, #tpu.memory_space<vmem>>, %arg3: memref<8x128xf32, #tpu.memory_space<vmem>>, %arg4: memref<8x128xf32, #tpu.memory_space<vmem>>) attributes {dimension_semantics = [#tpu.dimension_semantics<parallel>], iteration_bounds = array<i64: 2>, scalar_prefetch = 0 : i64, scratch_operands = 0 : i64, tpu.core_type = #tpu.core_type<tc>, window_params = [{transform_indices = @transform_0, window_bounds = array<i64: 8, 1>}, {pipeline_mode = #tpu.pipeline_mode<synchronous>, transform_indices = @transform_1, window_bounds = array<i64: 64, 128>}, {transform_indices = @transform_2, window_bounds = array<i64: 8, 128>}, {transform_indices = @transform_3, window_bounds = array<i64: 8, 128>}]} {
    %c0 = arith.constant 0 : index
    %c0_0 = arith.constant 0 : index
    %0 = vector.load %arg1[%c0, %c0_0] : memref<8x1xi32, #tpu.memory_space<vmem>>, vector<8x1xi32>
    %1 = tpu.iota {dimensions = array<i32: 1>} : vector<8x64xi32>
    %2 = vector.broadcast %0 : vector<8x1xi32> to vector<8x64xi32>
    %3 = arith.cmpi eq, %1, %2 : vector<8x64xi32>
    %4 = arith.extui %3 : vector<8x64xi1> to vector<8x64xi32>
    %5 = arith.sitofp %4 : vector<8x64xi32> to vector<8x64xf32>
    %c0_1 = arith.constant 0 : index
    %c0_2 = arith.constant 0 : index
    %6 = vector.load %arg2[%c0_1, %c0_2] : memref<64x128xf32, #tpu.memory_space<vmem>>, vector<64x128xf32>
    %cst = arith.constant dense<0.000000e+00> : vector<8x128xf32>
    %7 = tpu.matmul %5, %6, %cst {dimension_numbers = #tpu.dot_dimension_numbers<[1], [0], [0], [1], [0, 0, 1, 1], [], []>} : vector<8x64xf32>, vector<64x128xf32>, vector<8x128xf32> -> vector<8x128xf32>
    %c0_3 = arith.constant 0 : index
    %c0_4 = arith.constant 0 : index
    %8 = vector.load %arg3[%c0_3, %c0_4] : memref<8x128xf32, #tpu.memory_space<vmem>>, vector<8x128xf32>
    %9 = arith.addf %7, %8 : vector<8x128xf32>
    %c0_5 = arith.constant 0 : index
    %c0_6 = arith.constant 0 : index
    %10 = vector.load %arg4[%c0_5, %c0_6] : memref<8x128xf32, #tpu.memory_space<vmem>>, vector<8x128xf32>
    tpu.vector_store %arg4[%c0_5, %c0_6], %9 {strides = array<i32>} : memref<8x128xf32, #tpu.memory_space<vmem>>, vector<8x128xf32>,
    return
  }
  func.func @transform_0(%arg0: i32) -> (i32, i32) {
    %c0_i32 = arith.constant 0 : i32
    %c0_i32_0 = arith.constant 0 : i32
    return %arg0, %c0_i32 : i32, i32
  }
  func.func @transform_1(%arg0: i32) -> (i32, i32) {
    %c0_i32 = arith.constant 0 : i32
    %c0_i32_0 = arith.constant 0 : i32
    %c0_i32_1 = arith.constant 0 : i32
    return %c0_i32, %c0_i32_0 : i32, i32
  }
  func.func @transform_2(%arg0: i32) -> (i32, i32) {
    %c1_i32 = arith.constant 1 : i32
    %c0_i32 = arith.constant 0 : i32
    %0 = arith.cmpi eq, %c1_i32, %c0_i32 : i32
    %c1_i32_0 = arith.constant 1 : i32
    %1 = arith.select %0, %c1_i32_0, %c1_i32 : i32
    %2 = arith.remsi %arg0, %1 : i32
    %c0_i32_1 = arith.constant 0 : i32
    %3 = arith.cmpi ne, %2, %c0_i32_1 : i32
    %c0_i32_2 = arith.constant 0 : i32
    %4 = arith.cmpi slt, %2, %c0_i32_2 : i32
    %c0_i32_3 = arith.constant 0 : i32
    %5 = arith.cmpi slt, %1, %c0_i32_3 : i32
    %6 = arith.xori %4, %5 : i1
    %7 = arith.andi %6, %3 : i1
    %8 = arith.addi %2, %1 : i32
    %9 = arith.select %7, %8, %2 : i32
    %c0_i32_4 = arith.constant 0 : i32
    %c0_i32_5 = arith.constant 0 : i32
    return %9, %c0_i32_4 : i32, i32
  }
  func.func @transform_3(%arg0: i32) -> (i32, i32) {
    %c0_i32 = arith.constant 0 : i32
    %c0_i32_0 = arith.constant 0 : i32
    return %arg0, %c0_i32 : i32, i32
  }
}

module attributes {stable_mosaic.version = 11 : i64} {
  func.func @kernel(%arg0: i32, %arg1: memref<8x1xi32, #tpu.memory_space<vmem>>, %arg2: memref<64x128xf32, #tpu.memory_space<vmem>>, %arg3: memref<8x128xf32, #tpu.memory_space<vmem>>, %arg4: memref<8x128xf32, #tpu.memory_space<vmem>>) attributes {dimension_semantics = [#tpu.dimension_semantics<parallel>], iteration_bounds = array<i64: 2>, scalar_prefetch = 0 : i64, scratch_operands = 0 : i64, tpu.core_type = #tpu.core_type<tc>, window_params = [{transform_indices = @transform_0, window_bounds = array<i64: 8, 1>}, {pipeline_mode = #tpu.pipeline_mode<synchronous>, transform_indices = @transform_1, window_bounds = array<i64: 64, 128>}, {transform_indices = @transform_2, window_bounds = array<i64: 8, 128>}, {transform_indices = @transform_3, window_bounds = array<i64: 8, 128>}]} {
    %c0 = arith.constant 0 : index
    %c0_0 = arith.constant 0 : index
    %0 = vector.load %arg1[%c0, %c0_0] : memref<8x1xi32, #tpu.memory_space<vmem>>, vector<8x1xi32>
    %1 = tpu.iota {dimensions = array<i32: 1>} : vector<8x64xi32>
    %2 = vector.broadcast %0 : vector<8x1xi32> to vector<8x64xi32>
    %3 = arith.cmpi eq, %1, %2 : vector<8x64xi32>
    %4 = arith.extui %3 : vector<8x64xi1> to vector<8x64xi32>
    %5 = arith.sitofp %4 : vector<8x64xi32> to vector<8x64xf32>
    %c0_1 = arith.constant 0 : index
    %c0_2 = arith.constant 0 : index
    %6 = vector.load %arg2[%c0_1, %c0_2] : memref<64x128xf32, #tpu.memory_space<vmem>>, vector<64x128xf32>
    %cst = arith.constant dense<0.000000e+00> : vector<8x128xf32>
    %7 = tpu.matmul %5, %6, %cst {dimension_numbers = #tpu.dot_dimension_numbers<[1], [0], [0], [1], [0, 0, 1, 1], [], []>} : vector<8x64xf32>, vector<64x128xf32>, vector<8x128xf32> -> vector<8x128xf32>
    %c0_3 = arith.constant 0 : index
    %c0_4 = arith.constant 0 : index
    %8 = vector.load %arg3[%c0_3, %c0_4] : memref<8x128xf32, #tpu.memory_space<vmem>>, vector<8x128xf32>
    %9 = arith.addf %7, %8 : vector<8x128xf32>
    %c0_5 = arith.constant 0 : index
    %c0_6 = arith.constant 0 : index
    %10 = vector.load %arg4[%c0_5, %c0_6] : memref<8x128xf32, #tpu.memory_space<vmem>>, vector<8x128xf32>
    tpu.vector_store %arg4[%c0_5, %c0_6], %9 {strides = array<i32>} : memref<8x128xf32, #tpu.memory_space<vmem>>, vector<8x128xf32>,
    return
  }
  func.func @transform_0(%arg0: i32) -> (i32, i32) {
    %c0_i32 = arith.constant 0 : i32
    %c0_i32_0 = arith.constant 0 : i32
    return %arg0, %c0_i32 : i32, i32
  }
  func.func @transform_1(%arg0: i32) -> (i32, i32) {
    %c0_i32 = arith.constant 0 : i32
    %c0_i32_0 = arith.constant 0 : i32
    %c0_i32_1 = arith.constant 0 : i32
    return %c0_i32, %c0_i32_0 : i32, i32
  }
  func.func @transform_2(%arg0: i32) -> (i32, i32) {
    %c1_i32 = arith.constant 1 : i32
    %c0_i32 = arith.constant 0 : i32
    %0 = arith.cmpi eq, %c1_i32, %c0_i32 : i32
    %c1_i32_0 = arith.constant 1 : i32
    %1 = arith.select %0, %c1_i32_0, %c1_i32 : i32
    %2 = arith.remsi %arg0, %1 : i32
    %c0_i32_1 = arith.constant 0 : i32
    %3 = arith.cmpi ne, %2, %c0_i32_1 : i32
    %c0_i32_2 = arith.constant 0 : i32
    %4 = arith.cmpi slt, %2, %c0_i32_2 : i32
    %c0_i32_3 = arith.constant 0 : i32
    %5 = arith.cmpi slt, %1, %c0_i32_3 : i32
    %6 = arith.xori %4, %5 : i1
    %7 = arith.andi %6, %3 : i1
    %8 = arith.addi %2, %1 : i32
    %9 = arith.select %7, %8, %2 : i32
    %c0_i32_4 = arith.constant 0 : i32
    %c0_i32_5 = arith.constant 0 : i32
    return %9, %c0_i32_4 : i32, i32
  }
  func.func @transform_3(%arg0: i32) -> (i32, i32) {
    %c0_i32 = arith.constant 0 : i32
    %c0_i32_0 = arith.constant 0 : i32
    return %arg0, %c0_i32 : i32, i32
  }
}

</mosaic_0001>

<bundles_post_ra>
// kernel: tpu_custom_call.1
= control target key start
LH: loop header
LB: loop body
LE: loop exit
PB: predicated region body
PF: predicated region fallthrough
CT: control target
= control target key end

     0   :  { %8 = vsyncpa [#allocation3], 0  ;;  %s732_s0 = inlined_call_operand.vmem [shape: s32[16,1], index: 0, kind: input, shape index: {}]   ;;  %s733_s1 = inlined_call_operand.hbm [shape: f32[64,128], index: 1, kind: input, shape index: {}]   ;;  %s734_s2 = inlined_call_operand.vmem [shape: f32[8,128], index: 2, kind: input, shape index: {}]   ;;  %s735_s3 = inlined_call_operand.hbm [shape: f32[16,128], index: 3, kind: output, shape index: {}]  }
   0x1   :  { %9 = vsyncpa [#allocation4], 0 }
   0x2   :  { %11 = vsyncpa [#allocation4 + $0x1], 0  ;;  %s594_s12 = smov 0   ;;  %s596_s13 = smov 0  }
   0x3   :  { %s598_s14 = smov 0   ;;  %s600_s15 = smov 0  }
   0x4 LB: > { %s615_s16 = sadd.s32 4294967295, %s564_s15   ;;  %s359_s17 = sadd.s32 4294967294, %s564_s15   ;;  %s564_s15 = sphi %s600_s15, %s751_s15   ;;  %s560_s14 = sphi %s598_s14, %s750_s14   ;;  %s556_s13 = sphi %s596_s13, %s749_s13   ;;  %s552_s12 = sphi %s594_s12, %s748_s12  }
   0x5   : > { %s619_s18 = sadd.s32 1, %s564_s15   ;;  %s92_s19 = sadd.s32 1, %s560_s14 }
   0x6   : > { %s89_s20 = ssub.s32 %s564_s15, %s619_s18  ;;  %p102_p0 = scmp.ne.s32.totalorder %s560_s14, %s556_s13 }
   0x7   : > { %p90_p1 = scmp.eq.s32.totalorder %s89_s20, 0  ;;  %p103_p2 = scmp.eq.s32.totalorder %s615_s16, 1 }
   0x8   : > { %p108_p3 = scmp.ne.s32.totalorder %s556_s13, %s552_s12  ;;  %p109_p4 = scmp.eq.s32.totalorder %s359_s17, 1 }
   0x9   : > { %s630_s21 = scalar_select %p90_p1, %s560_s14, %s92_s19  }
   0xa   : > { %p632_p5 = por %p103_p2, %p102_p0  ;;  %p636_p6 = por %p109_p4, %p108_p3 }
   0xb   : > { %p360_p7 = scmp.ge.s32.totalorder %s564_s15, 1  ;;  %p116_p8 = scmp.lt.s32.totalorder %s564_s15, 3 }
   0xc   : > { %s739_s22 = scalar_select %p632_p5, 1, 0 }
   0xd   : > { %s740_s23 = scalar_select %p636_p6, 1, 0 }
   0xe   : > { %p736_p9 = scmp.eq.s32.totalorder %s615_s16, 0  ;;  %p643_p10 = pnand %p360_p7, %p116_p8 }
   0xf   : > { %s566_s25 = smov [#allocation2]   ;;  %s470_s30 = scalar_lea.hbm %s733_s1, 1024 }
  0x10   : > { %s741_s24 = scalar_select %p643_p10, 1, 0 }
  0x11   : > { %s128_s26 = sshll.u32 %s566_s25, 4  ;;  %p419_p11 = pneg %p643_p10  ;;  %s129_s26 = int_to_ptr.vmem [resolvable:$true] %s128_s26 }
  0x12   : > { %p471_p13 = scmp.ne.s32.totalorder %s733_s1, %s470_s30  ;;  %p477_p3 = scmp.lt.u32.totalorder %s470_s30, %s733_s1 }
  0x13   : > { %p651_p12 = pnand %p736_p9, %p419_p11 }
  0x15   : > { %p472_p0 = pneg %p651_p12 }
  0x17   : > { %p473_p1 = pnand %p472_p0, %p471_p13 }
  0x19   : > { %p474_p2 = pneg %p473_p1 }
  0x1b   : > { %p479_p4 = pnand %p477_p3, %p474_p2 }
  0x1d   : > { %482 = shalt.err (!%p479_p4)
}
  0x1e   : > { %s483_s8 = scalar_lea.vmem %s129_s26, 1024  ;;  %p491_p9 = scmp.lt.s32.totalorder %s129_s26, %s129_s26 }
  0x1f   : > { %p484_p7 = scmp.ne.s32.totalorder %s129_s26, %s483_s8  ;;  %p492_p6 = scmp.lt.s32.totalorder %s483_s8, %s483_s8 }
  0x21   : > { %p486_p8 = pnand %p484_p7, %p472_p0  ;;  %p493_p5 = por %p492_p6, %p491_p9 }
  0x23   : > { %p487_p11 = pneg %p486_p8 }
  0x25   : > { %p494_p10 = pnand %p493_p5, %p487_p11 }
  0x27   : > { %497 = shalt.err (!%p494_p10)
}
  0x28   : > { %s567_s9 = smov 128   ;;  %s568_s10 = smov 8  }
  0x29   : > { %422 = dma.hbm_to_vmem [thread:$0]  (!%p651_p12), %s733_s1, 1024, %s129_s26, [#allocation3], %s567_s9, %s567_s9, %s568_s10  }
  0x2a   : > { %p743_p13 = scmp.ne.s32.totalorder %s741_s24, 0 }
  0x2b   : > { %p744_p1 = scmp.eq.s32.totalorder (!%p743_p13), %s615_s16, 0 }
  0x2c   : > { %154 = sbr.rel (%p743_p13) target bundleno = 417 (0x1a1), region = 32 }
  0x33   : > { %543 = dma.done.wait (%p744_p1), [#allocation3], 1024   ;;  %p745_p0 = pmov %p744_p1 }
  0x34   : > { %p177_p5 = scmp.lt.s32.totalorder %s615_s16, 1  ;;  %v569_v0 = vmov 0   ;;  %v570_v1 = vmov 0.0|0.0   ;;  %v190_v3 = vld [vmem:[#allocation2] sm:$0xff]  ;;  %v191_v4 = vld [vmem:[#allocation2 + $0x8] sm:$0xff]  ;;  %v192_v6 = vld [vmem:[#allocation2 + $0x10] sm:$0xff]  ;;  %v182_v16 = vlaneseq }
  0x35   : > { %545 = vsyncadd (%p745_p0), [#allocation3], 4294966272  ;;  %469 = vset.pattern.permute.xlu0 %v569_v0  ;;  %401 = vmatprep.subr.bf16.mxu0 %v570_v1  ;;  %v402_v5 = vpack.c.bf16 %v191_v4, %v190_v3  ;;  %v193_v7 = vld [vmem:[#allocation2 + $0x18] sm:$0xff]  ;;  %vm571_vm0 = vmmov 0   ;;  %v572_v8 = vmov 0.0   ;;  %v194_v10 = vld [vmem:[#allocation2 + $0x20] sm:$0xff] }
  0x36   : > { %s178_s19 = scalar_select %p177_p5, %s615_s16, 1  ;;  %398 = vmatprep.mubr.msk.f32.mxu0 %vm571_vm0, %v572_v8  ;;  %v405_v9 = vpack.c.bf16 %v193_v7, %v192_v6  ;;  %v195_v11 = vld [vmem:[#allocation2 + $0x28] sm:$0xff]  ;;  %v196_v13 = vld [vmem:[#allocation2 + $0x30] sm:$0xff]  ;;  %v197_v14 = vld [vmem:[#allocation2 + $0x38] sm:$0xff]  ;;  %v183_v17 = vand.u32 127, %v182_v16  ;;  %vm199_vm1 = vcmask 523264  }
  0x37   : > { %403 = vmatpush3.bf16.msra.mxu0 %v402_v5  ;;  %v408_v12 = vpack.c.bf16 %v195_v11, %v194_v10  ;;  %v411_v15 = vpack.c.bf16 %v197_v14, %v196_v13  ;;  %s174_s27 = sand.u32 1, %s556_s13   ;;  %v198_v20 = vld [vmem:[%s734_s2] sm:$0xff]  ;;  %s370_s4 = sshll.u32 %s615_s16, 7 }
  0x38   : > { %s366_s20 = sshll.u32 %s178_s19, 3  ;;  %404 = vmatprep.subr.bf16.mxu0 %v570_v1  ;;  %s365_s28 = sshll.u32 %s174_s27, 3 }
  0x39   : > { %s180_s24 = scalar_lea.vmem %s732_s0, %s366_s20  ;;  %s176_s5 = scalar_lea.vmem [#allocation5], %s365_s28 }
  0x3a   : > { %v181_v2 = vld [vmem:[%s180_s24] sm:$0xff]  ;;  %s288_s6 = sshll.u32 %s176_s5, 4  ;;  %s690_s9 = scalar_lea.hbm %s735_s3, %s370_s4  ;;  %s692_s6 = int_to_ptr.vmem [resolvable:$true] %s288_s6 }
  0x3b   : > { %185 = vperm.xlu0 %469, %v181_v2   ;;  %406 = vmatpush3.bf16.msra.mxu0 %v405_v9  ;;  %s275_s10 = scalar_lea.sflag [#allocation4], %s174_s27  ;;  %s498_s11 = scalar_lea.vmem %s692_s6, 128 }
  0x3c   : > { %407 = vmatprep.subr.bf16.mxu0 %v570_v1  ;;  %p499_p6 = scmp.ne.s32.totalorder %s692_s6, %s498_s11  ;;  %p746_p9 = scmp.ne.s32.totalorder %s739_s22, 0 }
  0x3d   : > { %s573_s16 = smov [#allocation5]  }
  0x3e   : > { %p500_p10 = pnand %p499_p6, %p746_p9  ;;  %s502_s17 = sshll.u32 %s573_s16, 4  ;;  %s503_s17 = int_to_ptr.vmem [resolvable:$false] %s502_s17 }
  0x3f   : > { %409 = vmatpush3.bf16.msra.mxu0 %v408_v12  ;;  %s504_s19 = scalar_lea.vmem %s503_s17, 256  ;;  %p505_p2 = scmp.lt.s32.totalorder %s692_s6, %s503_s17 }
  0x40   : > { %410 = vmatprep.subr.bf16.mxu0 %v570_v1  ;;  %p501_p12 = pneg %p500_p10  ;;  %p506_p3 = scmp.lt.s32.totalorder %s504_s19, %s498_s11 }
  0x42   : > { %p507_p4 = por %p506_p3, %p505_p2 }
  0x43   : > { %412 = vmatpush3.bf16.msra.mxu0 %v411_v15 }
  0x44   : > { %p508_p7 = pnand %p507_p4, %p501_p12 }
  0xba   : > { %v186_v18 = vpop.permute.xlu0 %185 }
  0xbb   : > { %vm187_vm2 = vcmp.eq.s32.totalorder %v183_v17, %v186_v18 }
  0xbc   : > { %v367_v19 = vsel %vm187_vm2, 1.0, %v572_v8 }
  0xbd   : > { %399 = vmatmul.mubr.msk.f32.vlgmr.msra.gmra.mrb[0].mxu0 %vm199_vm1, %v367_v19 }
 0x190   : > { %v269_v21 = vpop.f32.mrb[0].mxu0 }
 0x191   : > { %v270_v22 = vadd.f32 %v269_v21, %v198_v20  ;;  %v400_v23 = vpop.f32.mrb[1].mxu0 }
 0x193   : > { %273 = vst [vmem:[%s176_s5] sm:$0xff] %v270_v22 }
 0x194   : > { %511 = shalt.err (!%p508_p7)
}
 0x195   : > { %s512_s20 = scalar_lea.hbm %s690_s9, 128  ;;  %s516_s24 = scalar_lea.hbm %s735_s3, 256 }
 0x196   : > { %p513_p8 = scmp.ne.s32.totalorder %s690_s9, %s512_s20  ;;  %p517_p1 = scmp.lt.u32.totalorder %s690_s9, %s735_s3 }
 0x197   : > { %p518_p0 = scmp.lt.u32.totalorder %s516_s24, %s512_s20  ;;  %p520_p6 = scmp.lt.u32.totalorder %s512_s20, %s690_s9 }
 0x198   : > { %p514_p11 = pnand %p513_p8, %p746_p9 }
 0x199   : > { %p519_p5 = por %p518_p0, %p517_p1 }
 0x19a   : > { %p515_p13 = pneg %p514_p11 }
 0x19b   : > { %p521_p10 = por %p520_p6, %p519_p5 }
 0x19d   : > { %p522_p12 = pnand %p521_p10, %p515_p13 }
 0x19f   : > { %525 = shalt.err (!%p522_p12)
}
 0x1a0   : > { %417 = dma.vmem_to_hbm [thread:$0]  (%p746_p9), %s692_s6, 128, %s690_s9, %s275_s10  }
 0x1a1 PF: > { %p429_p2 = scmp.ge.s32.totalorder %s564_s15, 2  ;;  %s300_s29 = sand.u32 1, %s552_s12  }
 0x1a2   : > { %p747_p3 = scmp.ne.s32.totalorder %s740_s23, 0  ;;  %s301_s30 = scalar_lea.sflag [#allocation4], %s300_s29 }
 0x1a4   : > { %p424_p4 = pnand %p429_p2, %p747_p3 }
 0x1a6   : > { %547 = dma.done.wait (!%p424_p4), %s301_s30, 128  }
 0x1a7   : > { %549 = vsyncadd (!%p424_p4), %s301_s30, 4294967168  ;;  %p14_p7 = scmp.ge.s32.totalorder %s619_s18, 4   ;;  %s748_s12 = smov %s556_s13 }
 0x1a8   : > { %s749_s13 = smov %s560_s14  ;;  %s750_s14 = smov %s630_s21 }
 0x1a9   : > { %s751_s15 = smov %s619_s18  ;;  %16 = sbr.rel (!%p14_p7) target bundleno = 4 (0x4), region = 72 }
 0x1b0   :  { %306 = vsyncpa [#allocation3], 1 }
 0x1b1   :  { %308 = vsyncpa [#allocation3 + $0x1], 1 }
 0x1b2   :  { %309 = vsyncpa [#allocation4], 1 }
 0x1b3   :  { %311 = vsyncpa [#allocation4 + $0x1], 1 }

// kernel: tpu_custom_call.1
= control target key start
LH: loop header
LB: loop body
LE: loop exit
PB: predicated region body
PF: predicated region fallthrough
CT: control target
= control target key end

     0   :  { %8 = vsyncpa [#allocation3], 0  ;;  %s732_s0 = inlined_call_operand.vmem [shape: s32[16,1], index: 0, kind: input, shape index: {}]   ;;  %s733_s1 = inlined_call_operand.hbm [shape: f32[64,128], index: 1, kind: input, shape index: {}]   ;;  %s734_s2 = inlined_call_operand.vmem [shape: f32[8,128], index: 2, kind: input, shape index: {}]   ;;  %s735_s3 = inlined_call_operand.hbm [shape: f32[16,128], index: 3, kind: output, shape index: {}]  }
   0x1   :  { %9 = vsyncpa [#allocation4], 0 }
   0x2   :  { %11 = vsyncpa [#allocation4 + $0x1], 0  ;;  %s594_s12 = smov 0   ;;  %s596_s13 = smov 0  }
   0x3   :  { %s598_s14 = smov 0   ;;  %s600_s15 = smov 0  }
   0x4 LB: > { %s615_s16 = sadd.s32 4294967295, %s564_s15   ;;  %s359_s17 = sadd.s32 4294967294, %s564_s15   ;;  %s564_s15 = sphi %s600_s15, %s751_s15   ;;  %s560_s14 = sphi %s598_s14, %s750_s14   ;;  %s556_s13 = sphi %s596_s13, %s749_s13   ;;  %s552_s12 = sphi %s594_s12, %s748_s12  }
   0x5   : > { %s619_s18 = sadd.s32 1, %s564_s15   ;;  %s92_s19 = sadd.s32 1, %s560_s14 }
   0x6   : > { %s89_s20 = ssub.s32 %s564_s15, %s619_s18  ;;  %p102_p0 = scmp.ne.s32.totalorder %s560_s14, %s556_s13 }
   0x7   : > { %p90_p1 = scmp.eq.s32.totalorder %s89_s20, 0  ;;  %p103_p2 = scmp.eq.s32.totalorder %s615_s16, 1 }
   0x8   : > { %p108_p3 = scmp.ne.s32.totalorder %s556_s13, %s552_s12  ;;  %p109_p4 = scmp.eq.s32.totalorder %s359_s17, 1 }
   0x9   : > { %s630_s21 = scalar_select %p90_p1, %s560_s14, %s92_s19  }
   0xa   : > { %p632_p5 = por %p103_p2, %p102_p0  ;;  %p636_p6 = por %p109_p4, %p108_p3 }
   0xb   : > { %p360_p7 = scmp.ge.s32.totalorder %s564_s15, 1  ;;  %p116_p8 = scmp.lt.s32.totalorder %s564_s15, 3 }
   0xc   : > { %s739_s22 = scalar_select %p632_p5, 1, 0 }
   0xd   : > { %s740_s23 = scalar_select %p636_p6, 1, 0 }
   0xe   : > { %p736_p9 = scmp.eq.s32.totalorder %s615_s16, 0  ;;  %p643_p10 = pnand %p360_p7, %p116_p8 }
   0xf   : > { %s566_s25 = smov [#allocation2]   ;;  %s470_s30 = scalar_lea.hbm %s733_s1, 1024 }
  0x10   : > { %s741_s24 = scalar_select %p643_p10, 1, 0 }
  0x11   : > { %s128_s26 = sshll.u32 %s566_s25, 4  ;;  %p419_p11 = pneg %p643_p10  ;;  %s129_s26 = int_to_ptr.vmem [resolvable:$true] %s128_s26 }
  0x12   : > { %p471_p13 = scmp.ne.s32.totalorder %s733_s1, %s470_s30  ;;  %p477_p3 = scmp.lt.u32.totalorder %s470_s30, %s733_s1 }
  0x13   : > { %p651_p12 = pnand %p736_p9, %p419_p11 }
  0x15   : > { %p472_p0 = pneg %p651_p12 }
  0x17   : > { %p473_p1 = pnand %p472_p0, %p471_p13 }
  0x19   : > { %p474_p2 = pneg %p473_p1 }
  0x1b   : > { %p479_p4 = pnand %p477_p3, %p474_p2 }
  0x1d   : > { %482 = shalt.err (!%p479_p4)
}
  0x1e   : > { %s483_s8 = scalar_lea.vmem %s129_s26, 1024  ;;  %p491_p9 = scmp.lt.s32.totalorder %s129_s26, %s129_s26 }
  0x1f   : > { %p484_p7 = scmp.ne.s32.totalorder %s129_s26, %s483_s8  ;;  %p492_p6 = scmp.lt.s32.totalorder %s483_s8, %s483_s8 }
  0x21   : > { %p486_p8 = pnand %p484_p7, %p472_p0  ;;  %p493_p5 = por %p492_p6, %p491_p9 }
  0x23   : > { %p487_p11 = pneg %p486_p8 }
  0x25   : > { %p494_p10 = pnand %p493_p5, %p487_p11 }
  0x27   : > { %497 = shalt.err (!%p494_p10)
}
  0x28   : > { %s567_s9 = smov 128   ;;  %s568_s10 = smov 8  }
  0x29   : > { %422 = dma.hbm_to_vmem [thread:$0]  (!%p651_p12), %s733_s1, 1024, %s129_s26, [#allocation3], %s567_s9, %s567_s9, %s568_s10  }
  0x2a   : > { %p743_p13 = scmp.ne.s32.totalorder %s741_s24, 0 }
  0x2b   : > { %p744_p1 = scmp.eq.s32.totalorder (!%p743_p13), %s615_s16, 0 }
  0x2c   : > { %154 = sbr.rel (%p743_p13) target bundleno = 417 (0x1a1), region = 32 }
  0x33   : > { %543 = dma.done.wait (%p744_p1), [#allocation3], 1024   ;;  %p745_p0 = pmov %p744_p1 }
  0x34   : > { %p177_p5 = scmp.lt.s32.totalorder %s615_s16, 1  ;;  %v569_v0 = vmov 0   ;;  %v570_v1 = vmov 0.0|0.0   ;;  %v190_v3 = vld [vmem:[#allocation2] sm:$0xff]  ;;  %v191_v4 = vld [vmem:[#allocation2 + $0x8] sm:$0xff]  ;;  %v192_v6 = vld [vmem:[#allocation2 + $0x10] sm:$0xff]  ;;  %v182_v16 = vlaneseq }
  0x35   : > { %545 = vsyncadd (%p745_p0), [#allocation3], 4294966272  ;;  %469 = vset.pattern.permute.xlu0 %v569_v0  ;;  %401 = vmatprep.subr.bf16.mxu0 %v570_v1  ;;  %v402_v5 = vpack.c.bf16 %v191_v4, %v190_v3  ;;  %v193_v7 = vld [vmem:[#allocation2 + $0x18] sm:$0xff]  ;;  %vm571_vm0 = vmmov 0   ;;  %v572_v8 = vmov 0.0   ;;  %v194_v10 = vld [vmem:[#allocation2 + $0x20] sm:$0xff] }
  0x36   : > { %s178_s19 = scalar_select %p177_p5, %s615_s16, 1  ;;  %398 = vmatprep.mubr.msk.f32.mxu0 %vm571_vm0, %v572_v8  ;;  %v405_v9 = vpack.c.bf16 %v193_v7, %v192_v6  ;;  %v195_v11 = vld [vmem:[#allocation2 + $0x28] sm:$0xff]  ;;  %v196_v13 = vld [vmem:[#allocation2 + $0x30] sm:$0xff]  ;;  %v197_v14 = vld [vmem:[#allocation2 + $0x38] sm:$0xff]  ;;  %v183_v17 = vand.u32 127, %v182_v16  ;;  %vm199_vm1 = vcmask 523264  }
  0x37   : > { %403 = vmatpush3.bf16.msra.mxu0 %v402_v5  ;;  %v408_v12 = vpack.c.bf16 %v195_v11, %v194_v10  ;;  %v411_v15 = vpack.c.bf16 %v197_v14, %v196_v13  ;;  %s174_s27 = sand.u32 1, %s556_s13   ;;  %v198_v20 = vld [vmem:[%s734_s2] sm:$0xff]  ;;  %s370_s4 = sshll.u32 %s615_s16, 7 }
  0x38   : > { %s366_s20 = sshll.u32 %s178_s19, 3  ;;  %404 = vmatprep.subr.bf16.mxu0 %v570_v1  ;;  %s365_s28 = sshll.u32 %s174_s27, 3 }
  0x39   : > { %s180_s24 = scalar_lea.vmem %s732_s0, %s366_s20  ;;  %s176_s5 = scalar_lea.vmem [#allocation5], %s365_s28 }
  0x3a   : > { %v181_v2 = vld [vmem:[%s180_s24] sm:$0xff]  ;;  %s288_s6 = sshll.u32 %s176_s5, 4  ;;  %s690_s9 = scalar_lea.hbm %s735_s3, %s370_s4  ;;  %s692_s6 = int_to_ptr.vmem [resolvable:$true] %s288_s6 }
  0x3b   : > { %185 = vperm.xlu0 %469, %v181_v2   ;;  %406 = vmatpush3.bf16.msra.mxu0 %v405_v9  ;;  %s275_s10 = scalar_lea.sflag [#allocation4], %s174_s27  ;;  %s498_s11 = scalar_lea.vmem %s692_s6, 128 }
  0x3c   : > { %407 = vmatprep.subr.bf16.mxu0 %v570_v1  ;;  %p499_p6 = scmp.ne.s32.totalorder %s692_s6, %s498_s11  ;;  %p746_p9 = scmp.ne.s32.totalorder %s739_s22, 0 }
  0x3d   : > { %s573_s16 = smov [#allocation5]  }
  0x3e   : > { %p500_p10 = pnand %p499_p6, %p746_p9  ;;  %s502_s17 = sshll.u32 %s573_s16, 4  ;;  %s503_s17 = int_to_ptr.vmem [resolvable:$false] %s502_s17 }
  0x3f   : > { %409 = vmatpush3.bf16.msra.mxu0 %v408_v12  ;;  %s504_s19 = scalar_lea.vmem %s503_s17, 256  ;;  %p505_p2 = scmp.lt.s32.totalorder %s692_s6, %s503_s17 }
  0x40   : > { %410 = vmatprep.subr.bf16.mxu0 %v570_v1  ;;  %p501_p12 = pneg %p500_p10  ;;  %p506_p3 = scmp.lt.s32.totalorder %s504_s19, %s498_s11 }
  0x42   : > { %p507_p4 = por %p506_p3, %p505_p2 }
  0x43   : > { %412 = vmatpush3.bf16.msra.mxu0 %v411_v15 }
  0x44   : > { %p508_p7 = pnand %p507_p4, %p501_p12 }
  0xba   : > { %v186_v18 = vpop.permute.xlu0 %185 }
  0xbb   : > { %vm187_vm2 = vcmp.eq.s32.totalorder %v183_v17, %v186_v18 }
  0xbc   : > { %v367_v19 = vsel %vm187_vm2, 1.0, %v572_v8 }
  0xbd   : > { %399 = vmatmul.mubr.msk.f32.vlgmr.msra.gmra.mrb[0].mxu0 %vm199_vm1, %v367_v19 }
 0x190   : > { %v269_v21 = vpop.f32.mrb[0].mxu0 }
 0x191   : > { %v270_v22 = vadd.f32 %v269_v21, %v198_v20  ;;  %v400_v23 = vpop.f32.mrb[1].mxu0 }
 0x193   : > { %273 = vst [vmem:[%s176_s5] sm:$0xff] %v270_v22 }
 0x194   : > { %511 = shalt.err (!%p508_p7)
}
 0x195   : > { %s512_s20 = scalar_lea.hbm %s690_s9, 128  ;;  %s516_s24 = scalar_lea.hbm %s735_s3, 256 }
 0x196   : > { %p513_p8 = scmp.ne.s32.totalorder %s690_s9, %s512_s20  ;;  %p517_p1 = scmp.lt.u32.totalorder %s690_s9, %s735_s3 }
 0x197   : > { %p518_p0 = scmp.lt.u32.totalorder %s516_s24, %s512_s20  ;;  %p520_p6 = scmp.lt.u32.totalorder %s512_s20, %s690_s9 }
 0x198   : > { %p514_p11 = pnand %p513_p8, %p746_p9 }
 0x199   : > { %p519_p5 = por %p518_p0, %p517_p1 }
 0x19a   : > { %p515_p13 = pneg %p514_p11 }
 0x19b   : > { %p521_p10 = por %p520_p6, %p519_p5 }
 0x19d   : > { %p522_p12 = pnand %p521_p10, %p515_p13 }
 0x19f   : > { %525 = shalt.err (!%p522_p12)
}
 0x1a0   : > { %417 = dma.vmem_to_hbm [thread:$0]  (%p746_p9), %s692_s6, 128, %s690_s9, %s275_s10  }
 0x1a1 PF: > { %p429_p2 = scmp.ge.s32.totalorder %s564_s15, 2  ;;  %s300_s29 = sand.u32 1, %s552_s12  }
 0x1a2   : > { %p747_p3 = scmp.ne.s32.totalorder %s740_s23, 0  ;;  %s301_s30 = scalar_lea.sflag [#allocation4], %s300_s29 }
 0x1a4   : > { %p424_p4 = pnand %p429_p2, %p747_p3 }
 0x1a6   : > { %547 = dma.done.wait (!%p424_p4), %s301_s30, 128  }
 0x1a7   : > { %549 = vsyncadd (!%p424_p4), %s301_s30, 4294967168  ;;  %p14_p7 = scmp.ge.s32.totalorder %s619_s18, 4   ;;  %s748_s12 = smov %s556_s13 }
 0x1a8   : > { %s749_s13 = smov %s560_s14  ;;  %s750_s14 = smov %s630_s21 }
 0x1a9   : > { %s751_s15 = smov %s619_s18  ;;  %16 = sbr.rel (!%p14_p7) target bundleno = 4 (0x4), region = 72 }
 0x1b0   :  { %306 = vsyncpa [#allocation3], 1 }
 0x1b1   :  { %308 = vsyncpa [#allocation3 + $0x1], 1 }
 0x1b2   :  { %309 = vsyncpa [#allocation4], 1 }
 0x1b3   :  { %311 = vsyncpa [#allocation4 + $0x1], 1 }

</bundles_post_ra>
